<compile_context>
chip_gen: v7x
topology: tpu7x:2x2x1
jax: 0.10.0
libtpu: 0.0.40
codegen_flags: <defaults>
</compile_context>

<pallas_src>
import jax
import jax.numpy as jnp
from jax.experimental import pallas as pl
from jax.experimental.pallas import tpu as pltpu


def _round_up(x, m):
    return (x + m - 1) // m * m


def _largest_divisor(n, limit, multiple):
    """Largest d with n % d == 0, d <= limit, d % multiple == 0; None if none exists."""
    d = (min(limit, n) // multiple) * multiple
    while d >= multiple:
        if n % d == 0:
            return d
        d -= multiple
    return None


def masked_mean_pool_kernel(embed_ref, w_ref, out_ref, acc_ref):
    """One (batch_tile, seq_chunk) grid step of the streaming weighted sum.

    embed_ref : [b_tile, s_chunk, H]  token-embedding chunk
    w_ref     : [b_tile, s_chunk, 1]  pre-normalized mask weights (f32)
    out_ref   : [b_tile, H]           pooled embeddings (written on last seq chunk)
    acc_ref   : [b_tile, H] f32       VMEM accumulator, persists across seq chunks
    """
    k = pl.program_id(1)

    @pl.when(k == 0)
    def _init():
        acc_ref[...] = jnp.zeros_like(acc_ref)

    # Weighted partial sum over this seq chunk, accumulated in f32. The weight
    # broadcast is a simple lane splat (w has a size-1 lane dim). Block sizing below
    # leaves headroom for a full f32 product temp in case Mosaic does not fuse the
    # mul into the axis-1 reduction.
    chunk = embed_ref[...].astype(jnp.float32) * w_ref[...]   # [b_tile, s_chunk, H]
    acc_ref[...] += jnp.sum(chunk, axis=1)                     # [b_tile, H]

    @pl.when(k == pl.num_programs(1) - 1)
    def _finalize():
        out_ref[...] = acc_ref[...].astype(out_ref.dtype)


def masked_mean_pool(token_embeddings, attention_mask, *,
                     b_tile=None, s_chunk=None,
                     target_block_bytes=8 * 1024 * 1024,
                     vmem_limit_bytes=48 * 1024 * 1024):
    """Masked mean pooling (OnnxSentenceTransformerWrapper.forward) as a tiled,
    pipelined Pallas TPU kernel."""
    B, S, H = token_embeddings.shape
    assert attention_mask.shape == (B, S)
    itemsize = jnp.dtype(token_embeddings.dtype).itemsize

    # Pre-normalize the mask into per-token weights in the wrapper:
    #   w[b, s] = mask[b, s] / clamp(sum_s mask[b, s], 1e-9)
    # This removes counts/clamp/divide from the kernel and any cross-chunk dependency.
    mask_f32 = attention_mask.astype(jnp.float32)
    counts = jnp.maximum(jnp.sum(mask_f32, axis=1, keepdims=True), 1e-9)   # [B, 1]
    weights = (mask_f32 / counts)[:, :, None]                              # [B, S, 1] f32

    # ---- batch tile: small, and a divisor of B (no batch padding) ---------------
    if b_tile is None:
        if B % 8 == 0:
            b_tile = 8                # many batch tiles -> v7x 2-TC split, long DMA runs
        else:
            b_tile = B                # single batch tile; block == full dim is legal
    b_tile = min(b_tile, B)

    # ---- seq chunk: multiple-of-8 divisor of S sized to ~target_block_bytes -----
    # Budget per sequence row: embed bytes + lane-padded (->128) f32 weight bytes.
    per_row_bytes = b_tile * (H * itemsize + 128 * 4)
    max_rows = max(8, target_block_bytes // per_row_bytes)
    if s_chunk is None:
        if S <= max_rows:
            s_chunk = S               # whole sequence in one chunk (full dim is legal)
        else:
            s_chunk = _largest_divisor(S, max_rows, 8)
            if s_chunk is None:
                # Rare fallback (S not a multiple of 8 and larger than one block):
                # pick a mult-of-8 chunk and pad below.
                s_chunk = max(8, (max_rows // 8) * 8)
    s_chunk = min(s_chunk, S)

    # ---- padding fallback (does NOT trigger for the auto-chosen tile sizes) -----
    B_pad = _round_up(B, b_tile)
    S_pad = _round_up(S, s_chunk)
    if (B_pad, S_pad) != (B, S):
        # Padded embeddings are finite zeros and padded weights are 0, so padded
        # positions contribute exactly 0 to the accumulator.
        token_embeddings = jnp.pad(
            token_embeddings, ((0, B_pad - B), (0, S_pad - S), (0, 0)))
        weights = jnp.pad(weights, ((0, B_pad - B), (0, S_pad - S), (0, 0)))

    grid = (B_pad // b_tile, S_pad // s_chunk)

    out_dtype = token_embeddings.dtype
    cost = pl.CostEstimate(
        flops=2 * B_pad * S_pad * H,
        transcendentals=0,
        bytes_accessed=(B_pad * S_pad * H * itemsize          # embeddings read
                        + B_pad * S_pad * 4                   # weights read
                        + B_pad * H * jnp.dtype(out_dtype).itemsize),  # output write
    )

    out = pl.pallas_call(
        masked_mean_pool_kernel,
        out_shape=jax.ShapeDtypeStruct((B_pad, H), out_dtype),
        grid_spec=pltpu.PrefetchScalarGridSpec(
            num_scalar_prefetch=0,
            grid=grid,
            in_specs=[
                pl.BlockSpec((b_tile, s_chunk, H), lambda i, k: (i, k, 0)),
                pl.BlockSpec((b_tile, s_chunk, 1), lambda i, k: (i, k, 0)),
            ],
            # Full-H, lane-dense output block; same block index across k so the
            # accumulator/output stays resident over the reduction axis.
            out_specs=pl.BlockSpec((b_tile, H), lambda i, k: (i, 0)),
            scratch_shapes=[pltpu.VMEM((b_tile, H), jnp.float32)],
        ),
        compiler_params=pltpu.CompilerParams(
            dimension_semantics=("parallel", "arbitrary"),
            vmem_limit_bytes=vmem_limit_bytes,
        ),
        cost_estimate=cost,
    )(token_embeddings, weights)

    return out[:B]


def _reference(token_embeddings, attention_mask):
    emb = token_embeddings.astype(jnp.float32)
    mask = attention_mask.astype(jnp.float32)[:, :, None]
    masked_sum = jnp.sum(emb * mask, axis=1)
    counts = jnp.maximum(jnp.sum(mask, axis=1), 1e-9)
    return masked_sum / counts


if __name__ == "__main__":
    key = jax.random.PRNGKey(0)
    k1, k2 = jax.random.split(key)

    # Case 1: small deterministic shapes, explicit s_chunk=8 so the accumulator
    # init / finalize path over 2 seq chunks is exercised (no padding: 8 | 16).
    B, S, H = 2, 16, 128
    # Synthetic "context_embedder(input_ids, attention_mask)[0]" output.
    emb1 = jax.random.normal(k1, (B, S, H), dtype=jnp.float32)
    mask1 = jnp.ones((B, S), dtype=jnp.float32)
    mask1 = mask1.at[1, 10:].set(0.0)            # pad last 6 tokens of batch element 1

    out1 = jax.block_until_ready(masked_mean_pool(emb1, mask1, s_chunk=8))
    ref1 = _reference(emb1, mask1)
    assert out1.shape == (B, H)
    assert jnp.allclose(out1, ref1, atol=1e-5, rtol=1e-5)

    # Case 2: auto tile sizing (b_tile=8 since B%8==0 -> two parallel batch tiles),
    # bf16 embeddings with f32 accumulation.
    B2, S2, H2 = 16, 64, 256
    emb2 = jax.random.normal(k2, (B2, S2, H2), dtype=jnp.float32).astype(jnp.bfloat16)
    mask2 = jnp.ones((B2, S2), dtype=jnp.float32)
    mask2 = mask2.at[3, 40:].set(0.0)
    mask2 = mask2.at[11, 1:].set(0.0)

    out2 = jax.block_until_ready(masked_mean_pool(emb2, mask2))
    ref2 = _reference(emb2, mask2)
    assert out2.shape == (B2, H2)
    assert jnp.allclose(out2.astype(jnp.float32), ref2, atol=2e-2, rtol=2e-2)

    print("KERNEL_OK")
</pallas_src>

<mosaic_0001>
module attributes {stable_mosaic.version = 11 : i64} {
  func.func @masked_mean_pool_kernel(%arg0: i32, %arg1: i32, %arg2: memref<2x8x128xf32, #tpu.memory_space<vmem>>, %arg3: memref<2x8x1xf32, #tpu.memory_space<vmem>>, %arg4: memref<2x128xf32, #tpu.memory_space<vmem>>, %arg5: memref<2x128xf32, #tpu.memory_space<vmem>>) attributes {dimension_semantics = [#tpu.dimension_semantics<parallel>, #tpu.dimension_semantics<arbitrary>], iteration_bounds = array<i64: 1, 2>, scalar_prefetch = 0 : i64, scratch_operands = 1 : i64, tpu.core_type = #tpu.core_type<tc>, window_params = [{transform_indices = @transform_0, window_bounds = array<i64: 2, 8, 128>}, {transform_indices = @transform_1, window_bounds = array<i64: 2, 8, 1>}, {transform_indices = @transform_2, window_bounds = array<i64: 2, 128>}]} {
    %c0_i32 = arith.constant 0 : i32
    %0 = arith.cmpi eq, %arg1, %c0_i32 : i32
    %1 = arith.extui %0 : i1 to i32
    %c0_i32_0 = arith.constant 0 : i32
    %2 = arith.cmpi ne, %1, %c0_i32_0 : i32
    scf.if %2 {
      %cst_11 = arith.constant 0.000000e+00 : f32
      %14 = vector.broadcast %cst_11 : f32 to vector<2x128xf32>
      %c0_12 = arith.constant 0 : index
      %c0_13 = arith.constant 0 : index
      %15 = vector.load %arg5[%c0_12, %c0_13] : memref<2x128xf32, #tpu.memory_space<vmem>>, vector<2x128xf32>
      tpu.vector_store %arg5[%c0_12, %c0_13], %14 {strides = array<i32>} : memref<2x128xf32, #tpu.memory_space<vmem>>, vector<2x128xf32>,
    } else {
    }
    %c0 = arith.constant 0 : index
    %c0_1 = arith.constant 0 : index
    %c0_2 = arith.constant 0 : index
    %3 = vector.load %arg2[%c0, %c0_1, %c0_2] : memref<2x8x128xf32, #tpu.memory_space<vmem>>, vector<2x8x128xf32>
    %c0_3 = arith.constant 0 : index
    %c0_4 = arith.constant 0 : index
    %c0_5 = arith.constant 0 : index
    %4 = vector.load %arg3[%c0_3, %c0_4, %c0_5] : memref<2x8x1xf32, #tpu.memory_space<vmem>>, vector<2x8x1xf32>
    %5 = vector.broadcast %4 : vector<2x8x1xf32> to vector<2x8x128xf32>
    %6 = arith.mulf %3, %5 : vector<2x8x128xf32>
    %c0_6 = arith.constant 0 : index
    %c0_7 = arith.constant 0 : index
    %7 = vector.load %arg5[%c0_6, %c0_7] : memref<2x128xf32, #tpu.memory_space<vmem>>, vector<2x128xf32>
    %cst = arith.constant dense<0.000000e+00> : vector<2x128xf32>
    %8 = vector.multi_reduction <add>, %6, %cst [1] : vector<2x8x128xf32> to vector<2x128xf32>
    %9 = arith.addf %7, %8 : vector<2x128xf32>
    %c0_8 = arith.constant 0 : index
    %c0_9 = arith.constant 0 : index
    %10 = vector.load %arg5[%c0_8, %c0_9] : memref<2x128xf32, #tpu.memory_space<vmem>>, vector<2x128xf32>
    tpu.vector_store %arg5[%c0_8, %c0_9], %9 {strides = array<i32>} : memref<2x128xf32, #tpu.memory_space<vmem>>, vector<2x128xf32>,
    %c1_i32 = arith.constant 1 : i32
    %11 = arith.cmpi eq, %arg1, %c1_i32 : i32
    %12 = arith.extui %11 : i1 to i32
    %c0_i32_10 = arith.constant 0 : i32
    %13 = arith.cmpi ne, %12, %c0_i32_10 : i32
    scf.if %13 {
      %c0_11 = arith.constant 0 : index
      %c0_12 = arith.constant 0 : index
      %14 = vector.load %arg5[%c0_11, %c0_12] : memref<2x128xf32, #tpu.memory_space<vmem>>, vector<2x128xf32>
      %c0_13 = arith.constant 0 : index
      %c0_14 = arith.constant 0 : index
      %15 = vector.load %arg4[%c0_13, %c0_14] : memref<2x128xf32, #tpu.memory_space<vmem>>, vector<2x128xf32>
      tpu.vector_store %arg4[%c0_13, %c0_14], %14 {strides = array<i32>} : memref<2x128xf32, #tpu.memory_space<vmem>>, vector<2x128xf32>,
    } else {
    }
    return
  }
  func.func @transform_0(%arg0: i32, %arg1: i32) -> (i32, i32, i32) {
    %c0_i32 = arith.constant 0 : i32
    %c0_i32_0 = arith.constant 0 : i32
    return %arg0, %arg1, %c0_i32 : i32, i32, i32
  }
  func.func @transform_1(%arg0: i32, %arg1: i32) -> (i32, i32, i32) {
    %c0_i32 = arith.constant 0 : i32
    %c0_i32_0 = arith.constant 0 : i32
    return %arg0, %arg1, %c0_i32 : i32, i32, i32
  }
  func.func @transform_2(%arg0: i32, %arg1: i32) -> (i32, i32) {
    %c0_i32 = arith.constant 0 : i32
    %c0_i32_0 = arith.constant 0 : i32
    return %arg0, %c0_i32 : i32, i32
  }
}

</mosaic_0001>

<bundles_post_ra>
// kernel: tpu_custom_call.1
= control target key start
LH: loop header
LB: loop body
LE: loop exit
PB: predicated region body
PF: predicated region fallthrough
CT: control target
= control target key end

     0   :  { %7 = vsyncpa [#allocation6], 0  ;;  %s543_s9 = smov 0   ;;  %s545_s10 = smov 0   ;;  %s648_s0 = inlined_call_operand.vmem [shape: f32[2,16,128], index: 0, kind: input, shape index: {}]   ;;  %s649_s1 = inlined_call_operand.vmem [shape: f32[2,16,1], index: 1, kind: input, shape index: {}]   ;;  %s650_s2 = inlined_call_operand.hbm [shape: f32[2,128], index: 2, kind: output, shape index: {}]  }
   0x1   :  { %s547_s11 = smov 0   ;;  %s549_s12 = smov 0  }
   0x2   :  { %s551_s13 = smov 0  }
   0x3 LB: > { %s389_s14 = sadd.s32 4294967295, %s523_s13   ;;  %s22_s15 = sadd.s32 1, %s519_s12  ;;  %s523_s13 = sphi %s551_s13, %s13_s13   ;;  %s519_s12 = sphi %s549_s12, %s656_s12   ;;  %s515_s11 = sphi %s547_s11, %s655_s11   ;;  %s511_s10 = sphi %s545_s10, %s654_s10   ;;  %s507_s9 = sphi %s543_s9, %s653_s9  }
   0x4   : > { %p23_p0 = scmp.ge.s32.totalorder %s22_s15, 2  ;;  %p41_p1 = scmp.ne.s32.totalorder %s511_s10, %s507_s9 }
   0x5   : > { %p42_p2 = scmp.eq.s32.totalorder %s523_s13, 0  ;;  %s34_s18 = sadd.s32 1, %s511_s10 }
   0x6   : > { %s658_s15 = smov (%p23_p0, %s22_s15), 0  ;;  %p391_p5 = scmp.ge.s32.totalorder %s523_s13, 2 }
   0x7   : > { %p575_p3 = por %p42_p2, %p41_p1  ;;  %s30_s17 = ssub.s32 %s519_s12, %s658_s15 }
   0x8   : > { %p32_p4 = scmp.eq.s32.totalorder %s30_s17, 0  ;;  %121 = sbr.rel (%p391_p5) target bundleno = 29 (0x1d), region = 16 }
   0xa   : > { %s583_s19 = scalar_select %p32_p4, %s511_s10, %s34_s18  }
   0xf   : > { %124 = sbr.rel (!%p575_p3) target bundleno = 22 (0x16), region = 20  ;;  %s126_s20 = sand.u32 (%p575_p3), 1, %s511_s10  }
  0x10   : > { %s393_s21 = sshll.u32 (%p575_p3), %s519_s12, 3  ;;  %s392_s22 = sshll.u32 (%p575_p3), %s126_s20, 4 }
  0x11   : > { %s133_s25 = scalar_lea.vmem (%p575_p3), %s648_s0, %s393_s21  ;;  %s128_s26 = scalar_lea.vmem (%p575_p3), [#allocation3], %s392_s22 }
  0x12   : > { %v163_v0 = vld [vmem:[%s133_s25] sm:$0xff] (%p575_p3)  ;;  %v165_v1 = vld [vmem:[%s133_s25 + $0x10] sm:$0xff] (%p575_p3) }
  0x13   : > { %164 = vst [vmem:[%s128_s26] sm:$0xff] (%p575_p3), %v163_v0  ;;  %166 = vst [vmem:[%s128_s26 + $0x8] sm:$0xff] (%p575_p3), %v165_v1 }
  0x16 PF: > { %172 = sbr.rel (!%p575_p3) target bundleno = 29 (0x1d), region = 58  ;;  %s174_s27 = sand.u32 (%p575_p3), 1, %s511_s10  }
  0x17   : > { %s395_s28 = sshll.u32 (%p575_p3), %s519_s12, 3  ;;  %s394_s29 = sshll.u32 (%p575_p3), %s174_s27, 4 }
  0x18   : > { %s181_s4 = scalar_lea.vmem (%p575_p3), %s649_s1, %s395_s28  ;;  %s176_s5 = scalar_lea.vmem (%p575_p3), [#allocation4], %s394_s29 }
  0x19   : > { %v211_v2 = vld [vmem:[%s181_s4] sm:$0xff] (%p575_p3)  ;;  %v213_v3 = vld [vmem:[%s181_s4 + $0x10] sm:$0xff] (%p575_p3) }
  0x1a   : > { %212 = vst [vmem:[%s176_s5] sm:$0xff] (%p575_p3), %v211_v2  ;;  %214 = vst [vmem:[%s176_s5 + $0x8] sm:$0xff] (%p575_p3), %v213_v3 }
  0x1d PF: > { %p396_p6 = scmp.ge.s32.totalorder %s523_s13, 1  ;;  %p219_p7 = scmp.lt.s32.totalorder %s523_s13, 3 }
  0x1f   : > { %p220_p8 = pnand %p396_p6, %p219_p7 }
  0x20   : > { %s226_s6 = sand.u32 (!%p220_p8), 1, %s507_s9   ;;  %p399_p9 = scmp.ne.s32.totalorder (!%p220_p8), %s515_s11, 0 }
  0x21   : > { %223 = sbr.rel (%p220_p8) target bundleno = 232 (0xe8), region = 96  ;;  %s397_s7 = sshll.u32 (!%p220_p8), %s226_s6, 4 }
  0x22   : > { %s228_s8 = scalar_lea.vmem (!%p220_p8), [#allocation3], %s397_s7  ;;  %s235_s16 = scalar_lea.vmem (!%p220_p8), [#allocation4], %s397_s7 }
  0x28   : > { %258 = sbr.rel (%p399_p9) target bundleno = 47 (0x2f), region = 108  ;;  %v525_v4 = vmov (!%p399_p9), 0.0  }
  0x29   : > { %259 = vst [vmem:[#allocation2] sm:$0x3] (!%p399_p9), %v525_v4 }
  0x2f PF: > { %v262_v5 = vld [vmem:[%s235_s16] sm:$0xff]  ;;  %v526_v6 = vmov 0   ;;  %v263_v7 = vld [vmem:[%s235_s16 + $0x8] sm:$0xff]  ;;  %vm291_vm0 = vcmask 1041409   ;;  %p400_p10 = scmp.ne.s32.totalorder %s515_s11, 1 }
  0x30   : > { %454 = vset.pattern.permute.xlu0 %v526_v6  ;;  %v260_v8 = vld [vmem:[%s228_s8] sm:$0xff]  ;;  %v261_v11 = vld [vmem:[%s228_s8 + $0x8] sm:$0xff] }
  0x31   : > { %266 = vperm.xlu0 %454, %v262_v5   ;;  %v276_v25 = vld [vmem:[#allocation2] sm:$0x3] }
  0x35   : > { %271 = vperm.xlu0 %454, %v263_v7  }
  0xb0   : > { %v267_v9 = vpop.permute.xlu0 %266 }
  0xb1   : > { %v274_v10 = vmul.f32 %v267_v9, %v260_v8 }
  0xb3   : > { %v277_v12 = vrot.slane %v274_v10, 4 }
  0xb4   : > { %v272_v13 = vpop.permute.xlu0 %271 }
  0xb5   : > { %v278_v14 = vadd.f32 %v277_v12, %v274_v10  ;;  %v275_v15 = vmul.f32 %v272_v13, %v261_v11 }
  0xb7   : > { %v279_v16 = vrot.slane %v278_v14, 2  ;;  %v283_v17 = vrot.slane %v275_v15, 4 }
  0xb9   : > { %v280_v18 = vadd.f32 %v279_v16, %v278_v14  ;;  %v284_v19 = vadd.f32 %v283_v17, %v275_v15 }
  0xbb   : > { %v285_v20 = vrot.slane %v284_v19, 2  ;;  %v281_v21 = vrot.slane %v280_v18, 1 }
  0xbd   : > { %v286_v22 = vadd.f32 %v285_v20, %v284_v19  ;;  %v282_v24 = vadd.f32 %v281_v21, %v280_v18 }
  0xbf   : > { %v287_v23 = vrot.slane %v286_v22, 1 }
  0xc0   : > { %299 = sbr.rel (%p400_p10) target bundleno = 207 (0xcf), region = 112 }
  0xc1   : > { %v288_v26 = vadd.f32 %v287_v23, %v286_v22 }
  0xc3   : > { %v292_v27 = vsel %vm291_vm0, %v288_v26, %v282_v24 }
  0xc4   : > { %v294_v28 = vadd.f32 %v292_v27, %v276_v25 }
  0xc6   : > { %295 = vst [vmem:[#allocation2] sm:$0x3] %v294_v28 }
  0xcd   : > { %v300_v29 = vld [vmem:[#allocation2] sm:$0x3] }
  0xce   : > { %301 = vst [vmem:[#allocation5] sm:$0x3] %v300_v29 }
  0xcf PF: > { %p607_p11 = scmp.eq.s32.totalorder %s389_s14, 1  ;;  %s527_s17 = smov [#allocation5]  }
  0xd0   : > { %s311_s18 = sshll.u32 %s527_s17, 4  ;;  %s312_s18 = int_to_ptr.vmem [resolvable:$true] %s311_s18 }
  0xd1   : > { %s455_s20 = scalar_lea.vmem %s312_s18, 32  ;;  %p462_p1 = scmp.lt.s32.totalorder %s312_s18, %s312_s18 }
  0xd2   : > { %p456_p12 = scmp.ne.s32.totalorder %s312_s18, %s455_s20  ;;  %p463_p2 = scmp.lt.s32.totalorder %s455_s20, %s455_s20 }
  0xd4   : > { %p457_p13 = pnand %p456_p12, %p607_p11  ;;  %p464_p3 = por %p463_p2, %p462_p1 }
  0xd6   : > { %p458_p0 = pneg %p457_p13 }
  0xd8   : > { %p465_p4 = pnand %p464_p3, %p458_p0 }
  0xda   : > { %468 = shalt.err (!%p465_p4)
}
  0xdb   : > { %s469_s14 = scalar_lea.hbm %s650_s2, 32 }
  0xdc   : > { %p470_p5 = scmp.ne.s32.totalorder %s650_s2, %s469_s14  ;;  %p475_p8 = scmp.lt.u32.totalorder %s469_s14, %s650_s2 }
  0xde   : > { %p471_p6 = pnand %p470_p5, %p607_p11 }
  0xe0   : > { %p472_p7 = pneg %p471_p6 }
  0xe2   : > { %p477_p9 = pnand %p475_p8, %p472_p7 }
  0xe4   : > { %480 = shalt.err (!%p477_p9)
}
  0xe5   : > { %406 = dma.vmem_to_hbm [thread:$0]  (%p607_p11), %s312_s18, 32, %s650_s2, [#allocation6]  }
  0xe6   : > { %502 = dma.done.wait (%p607_p11), [#allocation6], 32  }
  0xe7   : > { %504 = vsyncadd (%p607_p11), [#allocation6], 4294967264 }
  0xe8 PF: > { %s13_s13 = sadd.s32 1, %s523_s13   ;;  %s653_s9 = smov %s511_s10 }
  0xe9   : > { %p10_p10 = scmp.ge.s32.totalorder %s13_s13, 4   ;;  %s654_s10 = smov %s583_s19 }
  0xea   : > { %s655_s11 = smov %s519_s12  ;;  %s656_s12 = smov %s658_s15 }
  0xeb   :  { %12 = sbr.rel (!%p10_p10) target bundleno = 3 (0x3), region = 153 }
  0xf2   :  { %324 = vsyncpa [#allocation6], 1 }
  0xf3   :  { %326 = vsyncpa [#allocation6 + $0x1], 1 }

</bundles_post_ra>
